<compile_context>
chip_gen: v7x
topology: tpu7x:2x2x1
jax: 0.10.0
libtpu: 0.0.40
codegen_flags: <defaults>
</compile_context>

<pallas_src>
import functools

import jax
import jax.numpy as jnp
from jax.experimental import pallas as pl
from jax.experimental.pallas import tpu as pltpu

LANES = 128


def _round_up(x, m):
    return ((x + m - 1) // m) * m


# --------------------------------------------------------------------------- #
# Kernel
# --------------------------------------------------------------------------- #
def _dueling_q_kernel(s_ref, p_ref, out_ref, *, action_size):
    """s_ref: (block_b, S_pad); p_ref: (R, 128) packed params; out_ref: (block_b, 128)."""
    s_pad = s_ref.shape[1]
    wb_off = s_pad                 # fused branch weight  [fc_value | fc_adv]
    wh_off = s_pad + LANES         # fused block-diagonal head weight
    b_off = s_pad + 2 * LANES      # bias rows

    # Static, tile-aligned views of the packed parameter buffer (single DMA'd input).
    w1 = p_ref[0:s_pad, :]                    # (S_pad, 128)   fc1, zero-padded cols
    wb = p_ref[wb_off:wb_off + LANES, :]      # (128, 128)     [wv | wa]
    wh = p_ref[wh_off:wh_off + LANES, :]      # (128, 128)     heads (block diagonal)
    bias = p_ref[b_off:b_off + 8, :]          # (8, 128)       rows 0..2 = b1, b_branch, b_head

    # fc1 + relu  (lanes >= fc1_units stay exactly 0)
    x = jnp.dot(s_ref[...], w1, preferred_element_type=jnp.float32)
    x = jnp.maximum(x + bias[0:1, :], 0.0)

    # fused value/adv hidden layer + relu: lanes [0,F2) = value hidden, [F2,2F2) = adv hidden
    h = jnp.dot(x, wb, preferred_element_type=jnp.float32)
    h = jnp.maximum(h + bias[1:2, :], 0.0)

    # fused heads: lanes [0,A) = advantage, lane 127 = state value, rest = 0
    heads = jnp.dot(h, wh, preferred_element_type=jnp.float32) + bias[2:3, :]

    # Dueling combine with lane masks (keeps everything 128-lane dense; XLU reductions).
    lane = jax.lax.broadcasted_iota(jnp.int32, heads.shape, 1)
    adv_mask = lane < action_size
    adv = jnp.where(adv_mask, heads, 0.0)
    value = jnp.sum(jnp.where(lane == LANES - 1, heads, 0.0), axis=1, keepdims=True)
    mean_adv = jnp.sum(adv, axis=1, keepdims=True) * (1.0 / action_size)

    out_ref[...] = jnp.where(adv_mask, adv + value - mean_adv, 0.0)


# --------------------------------------------------------------------------- #
# Host-side wrapper
# --------------------------------------------------------------------------- #
def dueling_q_forward(state, packed_params, *, action_size):
    """state: (B, state_size) f32.  packed_params: (R, 128) f32 from pack_params()."""
    B, S = state.shape
    S_pad = _round_up(S, 8)
    R = packed_params.shape[0]
    assert packed_params.shape == (S_pad + 2 * LANES + 8, LANES)

    if S_pad != S:
        state = jnp.pad(state, ((0, 0), (0, S_pad - S)))

    block_b = min(_round_up(B, 8), 128)
    B_pad = _round_up(B, block_b)
    if B_pad != B:
        state = jnp.pad(state, ((0, B_pad - B), (0, 0)))

    grid = (B_pad // block_b,)
    kernel = functools.partial(_dueling_q_kernel, action_size=action_size)

    out = pl.pallas_call(
        kernel,
        out_shape=jax.ShapeDtypeStruct((B_pad, LANES), jnp.float32),
        grid_spec=pltpu.PrefetchScalarGridSpec(
            num_scalar_prefetch=0,
            grid=grid,
            in_specs=[
                pl.BlockSpec((block_b, S_pad), lambda i: (i, 0)),   # state: tiled over batch
                pl.BlockSpec((R, LANES), lambda i: (0, 0)),         # params: resident, DMA'd once
            ],
            out_specs=pl.BlockSpec((block_b, LANES), lambda i: (i, 0)),
        ),
        compiler_params=pltpu.CompilerParams(
            dimension_semantics=("parallel",) if B_pad >= 256 else ("arbitrary",),
        ),
    )(state, packed_params)

    # Lane-dense (B_pad, 128) block computed in-kernel; slice to real shape here.
    return out[:B, :action_size]


# --------------------------------------------------------------------------- #
# Parameter init / packing
# --------------------------------------------------------------------------- #
def init_params(key, state_size, action_size, fc1_units=64, fc2_units=64):
    """Mimics nn.Linear's U(-1/sqrt(fan_in), 1/sqrt(fan_in)); weights stored (in, out)."""
    def linear(k, fan_in, fan_out):
        kw, kb = jax.random.split(k)
        bound = 1.0 / jnp.sqrt(jnp.float32(fan_in))
        w = jax.random.uniform(kw, (fan_in, fan_out), jnp.float32, -bound, bound)
        b = jax.random.uniform(kb, (1, fan_out), jnp.float32, -bound, bound)
        return w, b

    k1, k2, k3, k4, k5 = jax.random.split(key, 5)
    w1, b1 = linear(k1, state_size, fc1_units)      # fc1
    wv, bv = linear(k2, fc1_units, fc2_units)       # fc_value
    wa, ba = linear(k3, fc1_units, fc2_units)       # fc_adv
    wv2, bv2 = linear(k4, fc2_units, 1)             # value head
    wa2, ba2 = linear(k5, fc2_units, action_size)   # adv head
    return dict(w1=w1, b1=b1, wv=wv, bv=bv, wa=wa, ba=ba,
                wv2=wv2, bv2=bv2, wa2=wa2, ba2=ba2)


def pack_params(p, state_size, action_size, fc1_units, fc2_units):
    """Pack all weights/biases into one (R, 128) f32 buffer (single DMA).

    Layout (rows):
      [0, S_pad)             : fc1 weight, cols [0, fc1_units), zero elsewhere
      [S_pad, S_pad+128)     : fused branch weight  [fc_value | fc_adv], zero-padded
      [S_pad+128, S_pad+256) : block-diag head weight: rows[0:F2] col 127 = value head,
                               rows[F2:2F2] cols [0:A) = adv head, zero elsewhere
      [S_pad+256, S_pad+264) : bias rows: 0 = b1, 1 = [bv | ba], 2 = [ba2 ... | bv2@127]
    """
    assert fc1_units <= LANES
    assert 2 * fc2_units <= LANES
    assert action_size <= LANES - 1
    S_pad = _round_up(state_size, 8)
    R = S_pad + 2 * LANES + 8
    buf = jnp.zeros((R, LANES), jnp.float32)

    # fc1
    buf = buf.at[:state_size, :fc1_units].set(p["w1"])
    # fused value/adv branch weight
    o = S_pad
    buf = buf.at[o:o + fc1_units, :fc2_units].set(p["wv"])
    buf = buf.at[o:o + fc1_units, fc2_units:2 * fc2_units].set(p["wa"])
    # fused block-diagonal heads (zero padding keeps the dueling mean clean)
    o = S_pad + LANES
    buf = buf.at[o:o + fc2_units, LANES - 1:LANES].set(p["wv2"])
    buf = buf.at[o + fc2_units:o + 2 * fc2_units, :action_size].set(p["wa2"])
    # bias rows
    o = S_pad + 2 * LANES
    buf = buf.at[o, :fc1_units].set(p["b1"][0])
    buf = buf.at[o + 1, :fc2_units].set(p["bv"][0])
    buf = buf.at[o + 1, fc2_units:2 * fc2_units].set(p["ba"][0])
    buf = buf.at[o + 2, :action_size].set(p["ba2"][0])
    buf = buf.at[o + 2, LANES - 1].set(p["bv2"][0, 0])
    return buf


def reference_forward(state, p):
    """Pure-JAX reference (same math as the PyTorch module)."""
    x = jnp.maximum(state @ p["w1"] + p["b1"], 0.0)
    v = jnp.maximum(x @ p["wv"] + p["bv"], 0.0)
    a = jnp.maximum(x @ p["wa"] + p["ba"], 0.0)
    value = v @ p["wv2"] + p["bv2"]
    adv = a @ p["wa2"] + p["ba2"]
    return value + adv - jnp.mean(adv, axis=1, keepdims=True)


if __name__ == "__main__":
    key = jax.random.PRNGKey(0)
    k_params, k_state = jax.random.split(key)

    batch, state_size, action_size = 8, 16, 8
    fc1_units, fc2_units = 64, 64

    params = init_params(k_params, state_size, action_size, fc1_units, fc2_units)
    packed = pack_params(params, state_size, action_size, fc1_units, fc2_units)
    state = jax.random.normal(k_state, (batch, state_size), jnp.float32)

    q = dueling_q_forward(state, packed, action_size=action_size)
    q = jax.block_until_ready(q)

    q_ref = reference_forward(state, params)
    assert q.shape == (batch, action_size)
    assert jnp.allclose(q, q_ref, atol=1e-5, rtol=1e-5), "mismatch vs pure-JAX reference"

    print("KERNEL_OK")
</pallas_src>

<mosaic_0001>
module attributes {stable_mosaic.version = 11 : i64} {
  func.func @_dueling_q_kernel(%arg0: i32, %arg1: memref<8x16xf32, #tpu.memory_space<vmem>>, %arg2: memref<280x128xf32, #tpu.memory_space<vmem>>, %arg3: memref<8x128xf32, #tpu.memory_space<vmem>>) attributes {dimension_semantics = [#tpu.dimension_semantics<arbitrary>], iteration_bounds = array<i64: 1>, scalar_prefetch = 0 : i64, scratch_operands = 0 : i64, tpu.core_type = #tpu.core_type<tc>, window_params = [{transform_indices = @transform_0, window_bounds = array<i64: 8, 16>}, {pipeline_mode = #tpu.pipeline_mode<synchronous>, transform_indices = @transform_1, window_bounds = array<i64: 280, 128>}, {transform_indices = @transform_2, window_bounds = array<i64: 8, 128>}]} {
    %c0 = arith.constant 0 : index
    %c0_0 = arith.constant 0 : index
    %0 = vector.load %arg2[%c0, %c0_0] : memref<280x128xf32, #tpu.memory_space<vmem>>, vector<16x128xf32>
    %c16 = arith.constant 16 : index
    %c0_1 = arith.constant 0 : index
    %1 = vector.load %arg2[%c16, %c0_1] : memref<280x128xf32, #tpu.memory_space<vmem>>, vector<128x128xf32>
    %c144 = arith.constant 144 : index
    %c0_2 = arith.constant 0 : index
    %2 = vector.load %arg2[%c144, %c0_2] : memref<280x128xf32, #tpu.memory_space<vmem>>, vector<128x128xf32>
    %c272 = arith.constant 272 : index
    %c0_3 = arith.constant 0 : index
    %3 = vector.load %arg2[%c272, %c0_3] : memref<280x128xf32, #tpu.memory_space<vmem>>, vector<8x128xf32>
    %c0_4 = arith.constant 0 : index
    %c0_5 = arith.constant 0 : index
    %4 = vector.load %arg1[%c0_4, %c0_5] : memref<8x16xf32, #tpu.memory_space<vmem>>, vector<8x16xf32>
    %cst = arith.constant dense<0.000000e+00> : vector<8x128xf32>
    %5 = tpu.matmul %4, %0, %cst {dimension_numbers = #tpu.dot_dimension_numbers<[1], [0], [0], [1], [0, 0, 1, 1], [], []>} : vector<8x16xf32>, vector<16x128xf32>, vector<8x128xf32> -> vector<8x128xf32>
    %6 = vector.extract_strided_slice %3 {offsets = [0, 0], sizes = [1, 128], strides = [1, 1]} : vector<8x128xf32> to vector<1x128xf32>
    %7 = vector.broadcast %6 : vector<1x128xf32> to vector<8x128xf32>
    %8 = arith.addf %5, %7 : vector<8x128xf32>
    %cst_6 = arith.constant 0.000000e+00 : f32
    %9 = vector.broadcast %cst_6 : f32 to vector<8x128xf32>
    %10 = arith.maximumf %8, %9 : vector<8x128xf32>
    %cst_7 = arith.constant dense<0.000000e+00> : vector<8x128xf32>
    %11 = tpu.matmul %10, %1, %cst_7 {dimension_numbers = #tpu.dot_dimension_numbers<[1], [0], [0], [1], [0, 0, 1, 1], [], []>} : vector<8x128xf32>, vector<128x128xf32>, vector<8x128xf32> -> vector<8x128xf32>
    %12 = vector.extract_strided_slice %3 {offsets = [1, 0], sizes = [1, 128], strides = [1, 1]} : vector<8x128xf32> to vector<1x128xf32>
    %13 = vector.broadcast %12 : vector<1x128xf32> to vector<8x128xf32>
    %14 = arith.addf %11, %13 : vector<8x128xf32>
    %cst_8 = arith.constant 0.000000e+00 : f32
    %15 = vector.broadcast %cst_8 : f32 to vector<8x128xf32>
    %16 = arith.maximumf %14, %15 : vector<8x128xf32>
    %cst_9 = arith.constant dense<0.000000e+00> : vector<8x128xf32>
    %17 = tpu.matmul %16, %2, %cst_9 {dimension_numbers = #tpu.dot_dimension_numbers<[1], [0], [0], [1], [0, 0, 1, 1], [], []>} : vector<8x128xf32>, vector<128x128xf32>, vector<8x128xf32> -> vector<8x128xf32>
    %18 = vector.extract_strided_slice %3 {offsets = [2, 0], sizes = [1, 128], strides = [1, 1]} : vector<8x128xf32> to vector<1x128xf32>
    %19 = vector.broadcast %18 : vector<1x128xf32> to vector<8x128xf32>
    %20 = arith.addf %17, %19 : vector<8x128xf32>
    %21 = tpu.iota {dimensions = array<i32: 1>} : vector<8x128xi32>
    %c8_i32 = arith.constant 8 : i32
    %22 = vector.broadcast %c8_i32 : i32 to vector<8x128xi32>
    %23 = arith.cmpi slt, %21, %22 : vector<8x128xi32>
    %cst_10 = arith.constant 0.000000e+00 : f32
    %24 = vector.broadcast %cst_10 : f32 to vector<8x128xf32>
    %25 = arith.select %23, %20, %24 : vector<8x128xi1>, vector<8x128xf32>
    %c127_i32 = arith.constant 127 : i32
    %26 = vector.broadcast %c127_i32 : i32 to vector<8x128xi32>
    %27 = arith.cmpi eq, %21, %26 : vector<8x128xi32>
    %cst_11 = arith.constant 0.000000e+00 : f32
    %28 = vector.broadcast %cst_11 : f32 to vector<8x128xf32>
    %29 = arith.select %27, %20, %28 : vector<8x128xi1>, vector<8x128xf32>
    %cst_12 = arith.constant dense<0.000000e+00> : vector<8xf32>
    %30 = vector.multi_reduction <add>, %29, %cst_12 [1] : vector<8x128xf32> to vector<8xf32>
    %31 = vector.shape_cast %30 : vector<8xf32> to vector<8x1xf32>
    %cst_13 = arith.constant dense<0.000000e+00> : vector<8xf32>
    %32 = vector.multi_reduction <add>, %25, %cst_13 [1] : vector<8x128xf32> to vector<8xf32>
    %33 = vector.shape_cast %32 : vector<8xf32> to vector<8x1xf32>
    %cst_14 = arith.constant 1.250000e-01 : f32
    %34 = vector.broadcast %cst_14 : f32 to vector<8x1xf32>
    %35 = arith.mulf %33, %34 : vector<8x1xf32>
    %36 = vector.broadcast %31 : vector<8x1xf32> to vector<8x128xf32>
    %37 = arith.addf %25, %36 : vector<8x128xf32>
    %38 = vector.broadcast %35 : vector<8x1xf32> to vector<8x128xf32>
    %39 = arith.subf %37, %38 : vector<8x128xf32>
    %cst_15 = arith.constant 0.000000e+00 : f32
    %40 = vector.broadcast %cst_15 : f32 to vector<8x128xf32>
    %41 = arith.select %23, %39, %40 : vector<8x128xi1>, vector<8x128xf32>
    %c0_16 = arith.constant 0 : index
    %c0_17 = arith.constant 0 : index
    %42 = vector.load %arg3[%c0_16, %c0_17] : memref<8x128xf32, #tpu.memory_space<vmem>>, vector<8x128xf32>
    tpu.vector_store %arg3[%c0_16, %c0_17], %41 {strides = array<i32>} : memref<8x128xf32, #tpu.memory_space<vmem>>, vector<8x128xf32>,
    return
  }
  func.func @transform_0(%arg0: i32) -> (i32, i32) {
    %c0_i32 = arith.constant 0 : i32
    %c0_i32_0 = arith.constant 0 : i32
    return %arg0, %c0_i32 : i32, i32
  }
  func.func @transform_1(%arg0: i32) -> (i32, i32) {
    %c0_i32 = arith.constant 0 : i32
    %c0_i32_0 = arith.constant 0 : i32
    %c0_i32_1 = arith.constant 0 : i32
    return %c0_i32, %c0_i32_0 : i32, i32
  }
  func.func @transform_2(%arg0: i32) -> (i32, i32) {
    %c0_i32 = arith.constant 0 : i32
    %c0_i32_0 = arith.constant 0 : i32
    return %arg0, %c0_i32 : i32, i32
  }
}

</mosaic_0001>

<bundles_post_ra>
// kernel: tpu_custom_call.1
= control target key start
LH: loop header
LB: loop body
LE: loop exit
PB: predicated region body
PF: predicated region fallthrough
CT: control target
= control target key end

     0   :  { %7 = vsyncpa [#allocation3], 0  ;;  %s665_s0 = inlined_call_operand.hbm [shape: f32[8,16], index: 0, kind: input, shape index: {}]   ;;  %s666_s1 = inlined_call_operand.hbm [shape: f32[280,128], index: 1, kind: input, shape index: {}]   ;;  %s667_s2 = inlined_call_operand.hbm [shape: f32[8,128], index: 2, kind: output, shape index: {}]  }
   0x1   :  { %8 = vsyncpa [#allocation6], 0 }
   0x2   :  { %9 = vsyncpa [#allocation4], 0  ;;  %s579_s9 = smov [#allocation2]   ;;  %s580_s11 = smov [#allocation5]  }
   0x3   :  { %s16_s10 = sshll.u32 %s579_s9, 4  ;;  %s25_s12 = sshll.u32 %s580_s11, 4  ;;  %s17_s10 = int_to_ptr.vmem [resolvable:$true] %s16_s10  ;;  %s602_s12 = int_to_ptr.vmem [resolvable:$true] %s25_s12 }
   0x4   :  { %s507_s15 = scalar_lea.hbm %s665_s0, 128 }
   0x5   :  { %p508_p0 = scmp.ne.s32.totalorder %s665_s0, %s507_s15  ;;  %p511_p1 = scmp.lt.u32.totalorder %s507_s15, %s665_s0 }
   0x7   :  { %p513_p2 = pnand %p511_p1, %p508_p0 }
   0x9   :  { %516 = shalt.err (!%p513_p2)
}
   0xa   :  { %s517_s20 = scalar_lea.vmem %s17_s10, 128  ;;  %p522_p4 = scmp.lt.s32.totalorder %s17_s10, %s17_s10 }
   0xb   :  { %p518_p3 = scmp.ne.s32.totalorder %s17_s10, %s517_s20  ;;  %p523_p5 = scmp.lt.s32.totalorder %s517_s20, %s517_s20 }
   0xd   :  { %p524_p6 = por %p523_p5, %p522_p4 }
   0xf   :  { %p525_p7 = pnand %p524_p6, %p518_p3 }
  0x11   :  { %528 = shalt.err (!%p525_p7)
}
  0x12   :  { %19 = dma.hbm_to_vmem [thread:$0]  %s665_s0, 128, %s17_s10, [#allocation3]  }
  0x13   :  { %s529_s25 = scalar_lea.hbm %s666_s1, 4480 }
  0x14   :  { %p530_p8 = scmp.ne.s32.totalorder %s666_s1, %s529_s25  ;;  %p533_p9 = scmp.lt.u32.totalorder %s529_s25, %s666_s1 }
  0x16   :  { %p535_p10 = pnand %p533_p9, %p530_p8 }
  0x18   :  { %538 = shalt.err (!%p535_p10)
}
  0x19   :  { %s539_s30 = scalar_lea.vmem %s602_s12, 4480  ;;  %p544_p12 = scmp.lt.s32.totalorder %s602_s12, %s602_s12 }
  0x1a   :  { %p540_p11 = scmp.ne.s32.totalorder %s602_s12, %s539_s30  ;;  %p545_p13 = scmp.lt.s32.totalorder %s539_s30, %s539_s30 }
  0x1c   :  { %p546_p0 = por %p545_p13, %p544_p12 }
  0x1e   :  { %p547_p1 = pnand %p546_p0, %p540_p11 }
  0x20   :  { %550 = shalt.err (!%p547_p1)
}
  0x21   :  { %s581_s0 = smov 128   ;;  %s582_s3 = smov 8  }
  0x22   :  { %31 = dma.hbm_to_vmem [thread:$0]  %s666_s1, 4480, %s602_s12, [#allocation6], %s581_s0, %s581_s0, %s582_s3  }
  0x23   :  { %573 = dma.done.wait [#allocation3], 128  }
  0x24   :  { %574 = vsyncadd [#allocation3], 4294967168 }
  0x25   :  { %575 = dma.done.wait [#allocation6], 4480  }
  0x26   :  { %576 = vsyncadd [#allocation6], 4294962816  ;;  %v583_v0 = vmov 0.0|0.0   ;;  %vm584_vm0 = vmmov 0   ;;  %v585_v1 = vmov 0.0   ;;  %v38_v2 = vld [vmem:[#allocation5] sm:$0xff]  ;;  %v74_v51 = vlaneseq }
  0x27   :  { %448 = vmatprep.subr.bf16.mxu0 %v583_v0  ;;  %375 = vmatprep.mubr.msk.f32.mxu0 %vm584_vm0, %v585_v1  ;;  %v39_v3 = vld [vmem:[#allocation5 + $0x8] sm:$0xff]  ;;  %v40_v5 = vld [vmem:[#allocation5 + $0x10] sm:$0xff]  ;;  %v41_v6 = vld [vmem:[#allocation5 + $0x18] sm:$0xff]  ;;  %vm78_vm1 = vcmask 130048   ;;  %s586_s1 = smov [#allocation7]  }
  0x28   :  { %451 = vmatprep.subr.bf16.mxu1 %v583_v0  ;;  %410 = vmatprep.mubr.msk.f32.mxu1 %vm584_vm0, %v585_v1  ;;  %v449_v4 = vpack.c.bf16 %v39_v3, %v38_v2  ;;  %v42_v7 = vld [vmem:[#allocation5 + $0x20] sm:$0xff]  ;;  %v452_v8 = vpack.c.bf16 %v41_v6, %v40_v5  ;;  %v43_v9 = vld [vmem:[#allocation5 + $0x28] sm:$0xff]  ;;  %v73_v10 = vld [vmem:[#allocation2] sm:$0xff]  ;;  %v75_v52 = vshrl.u32 %v74_v51, 7  ;;  %v303_v6 = vand.u32 127, %v74_v51  ;;  %s323_s6 = sshll.u32 %s586_s1, 4  ;;  %s324_s6 = int_to_ptr.vmem [resolvable:$true] %s323_s6 }
  0x29   :  { %v455_v11 = vpack.c.bf16 %v43_v9, %v42_v7  ;;  %v44_v12 = vld [vmem:[#allocation5 + $0x30] sm:$0xff]  ;;  %v45_v13 = vld [vmem:[#allocation5 + $0x38] sm:$0xff]  ;;  %v46_v15 = vld [vmem:[#allocation5 + $0x40] sm:$0xff]  ;;  %s551_s7 = scalar_lea.vmem %s324_s6, 128  ;;  %p556_p3 = scmp.lt.s32.totalorder %s324_s6, %s324_s6 }
  0x2a   :  { %450 = vmatpush3.bf16.msra.mxu0 %v449_v4  ;;  %453 = vmatpush3.bf16.msra.mxu1 %v452_v8  ;;  %v458_v14 = vpack.c.bf16 %v45_v13, %v44_v12  ;;  %v47_v16 = vld [vmem:[#allocation5 + $0x48] sm:$0xff]  ;;  %v48_v18 = vld [vmem:[#allocation5 + $0x50] sm:$0xff]  ;;  %v49_v19 = vld [vmem:[#allocation5 + $0x58] sm:$0xff]  ;;  %v76_v53 = vsub.s32 0, %v75_v52  ;;  %v155_v63 = vsub.s32 1, %v75_v52  ;;  %v230_v5 = vsub.s32 2, %v75_v52  ;;  %p552_p2 = scmp.ne.s32.totalorder %s324_s6, %s551_s7  ;;  %p557_p4 = scmp.lt.s32.totalorder %s551_s7, %s551_s7 }
  0x2b   :  { %475 = vmatprep.subr.bf16.mxu0 %v583_v0  ;;  %454 = vmatprep.subr.bf16.mxu1 %v583_v0  ;;  %v461_v17 = vpack.c.bf16 %v47_v16, %v46_v15  ;;  %v464_v20 = vpack.c.bf16 %v49_v19, %v48_v18  ;;  %v50_v21 = vld [vmem:[#allocation5 + $0x60] sm:$0xff]  ;;  %v51_v22 = vld [vmem:[#allocation5 + $0x68] sm:$0xff]  ;;  %v52_v24 = vld [vmem:[#allocation5 + $0x70] sm:$0xff]  ;;  %vm306_vm2 = vcmp.eq.s32.totalorder %v303_v6, 127  ;;  %vm304_vm3 = vcmp.lt.s32.totalorder %v303_v6, 8 }
  0x2c   :  { %v467_v23 = vpack.c.bf16 %v51_v22, %v50_v21  ;;  %v53_v25 = vld [vmem:[#allocation5 + $0x78] sm:$0xff]  ;;  %v54_v27 = vld [vmem:[#allocation5 + $0x80] sm:$0xff]  ;;  %v55_v28 = vld [vmem:[#allocation5 + $0x88] sm:$0xff]  ;;  %p558_p5 = por %p557_p4, %p556_p3 }
  0x2d   :  { %376 = vmatmul.mubr.msk.f32.vlgmr.msra.gmra.mrb[0].mxu0 %vm78_vm1, %v73_v10  ;;  %v470_v26 = vpack.c.bf16 %v53_v25, %v52_v24  ;;  %v473_v29 = vpack.c.bf16 %v55_v28, %v54_v27  ;;  %v56_v30 = vld [vmem:[#allocation5 + $0x90] sm:$0xff]  ;;  %v57_v31 = vld [vmem:[#allocation5 + $0x98] sm:$0xff]  ;;  %v58_v32 = vld [vmem:[#allocation5 + $0xa0] sm:$0xff] }
  0x2e   :  { %445 = vmatprep.mubr.msk.f32.mxu0 %vm584_vm0, %v585_v1  ;;  %456 = vmatpush3.bf16.msra.mxu1 %v455_v11  ;;  %v476_v33 = vpack.c.bf16 %v57_v31, %v56_v30  ;;  %v59_v34 = vld [vmem:[#allocation5 + $0xa8] sm:$0xff]  ;;  %v60_v36 = vld [vmem:[#allocation5 + $0xb0] sm:$0xff]  ;;  %v61_v37 = vld [vmem:[#allocation5 + $0xb8] sm:$0xff]  ;;  %p559_p6 = pnand %p558_p5, %p552_p2 }
  0x2f   :  { %457 = vmatprep.subr.bf16.mxu1 %v583_v0  ;;  %v479_v35 = vpack.c.bf16 %v59_v34, %v58_v32  ;;  %v482_v38 = vpack.c.bf16 %v61_v37, %v60_v36  ;;  %v62_v39 = vld [vmem:[#allocation5 + $0xc0] sm:$0xff]  ;;  %v63_v40 = vld [vmem:[#allocation5 + $0xc8] sm:$0xff]  ;;  %v64_v42 = vld [vmem:[#allocation5 + $0xd0] sm:$0xff] }
  0x30   :  { %477 = vmatpush3.bf16.msra.mxu0 %v476_v33  ;;  %v485_v41 = vpack.c.bf16 %v63_v40, %v62_v39  ;;  %v65_v43 = vld [vmem:[#allocation5 + $0xd8] sm:$0xff]  ;;  %v66_v45 = vld [vmem:[#allocation5 + $0xe0] sm:$0xff]  ;;  %v67_v46 = vld [vmem:[#allocation5 + $0xe8] sm:$0xff] }
  0x31   :  { %478 = vmatprep.subr.bf16.mxu0 %v583_v0  ;;  %v488_v44 = vpack.c.bf16 %v65_v43, %v64_v42  ;;  %v491_v47 = vpack.c.bf16 %v67_v46, %v66_v45  ;;  %v68_v48 = vld [vmem:[#allocation5 + $0xf0] sm:$0xff]  ;;  %v69_v49 = vld [vmem:[#allocation5 + $0xf8] sm:$0xff]  ;;  %v70_v60 = vld [vmem:[#allocation5 + $0x100] sm:$0xff] }
  0x32   :  { %459 = vmatpush3.bf16.msra.mxu1 %v458_v14  ;;  %v494_v50 = vpack.c.bf16 %v69_v49, %v68_v48  ;;  %v72_v54 = vld [vmem:[#allocation5 + $0x110] sm:$0xff]  ;;  %v71_v61 = vld [vmem:[#allocation5 + $0x108] sm:$0xff] }
  0x33   :  { %460 = vmatprep.subr.bf16.mxu1 %v583_v0  ;;  %v77_v55 = vrot.slane %v72_v54, %v76_v53  ;;  %v497_v62 = vpack.c.bf16 %v71_v61, %v70_v60  ;;  %v156_v1 = vrot.slane %v72_v54, %v155_v63  ;;  %v231_v7 = vrot.slane %v72_v54, %v230_v5 }
  0x34   :  { %480 = vmatpush3.bf16.msra.mxu0 %v479_v35 }
  0x35   :  { %481 = vmatprep.subr.bf16.mxu0 %v583_v0 }
  0x36   :  { %462 = vmatpush3.bf16.msra.mxu1 %v461_v17 }
  0x37   :  { %463 = vmatprep.subr.bf16.mxu1 %v583_v0 }
  0x38   :  { %483 = vmatpush3.bf16.msra.mxu0 %v482_v38 }
  0x39   :  { %484 = vmatprep.subr.bf16.mxu0 %v583_v0 }
  0x3a   :  { %465 = vmatpush3.bf16.msra.mxu1 %v464_v20 }
  0x3b   :  { %466 = vmatprep.subr.bf16.mxu1 %v583_v0 }
  0x3c   :  { %486 = vmatpush3.bf16.msra.mxu0 %v485_v41 }
  0x3d   :  { %487 = vmatprep.subr.bf16.mxu0 %v583_v0 }
  0x3e   :  { %468 = vmatpush3.bf16.msra.mxu1 %v467_v23 }
  0x3f   :  { %469 = vmatprep.subr.bf16.mxu1 %v583_v0 }
  0x40   :  { %489 = vmatpush3.bf16.msra.mxu0 %v488_v44 }
  0x41   :  { %490 = vmatprep.subr.bf16.mxu0 %v583_v0 }
  0x42   :  { %471 = vmatpush3.bf16.msra.mxu1 %v470_v26 }
  0x43   :  { %472 = vmatprep.subr.bf16.mxu1 %v583_v0 }
  0x44   :  { %492 = vmatpush3.bf16.msra.mxu0 %v491_v47 }
  0x45   :  { %493 = vmatprep.subr.bf16.mxu0 %v583_v0 }
  0x46   :  { %474 = vmatpush3.bf16.msra.mxu1 %v473_v29 }
  0x48   :  { %495 = vmatpush3.bf16.msra.mxu0 %v494_v50 }
  0x49   :  { %496 = vmatprep.subr.bf16.mxu0 %v583_v0 }
  0x4c   :  { %498 = vmatpush3.bf16.msra.mxu0 %v497_v62 }
 0x100   :  { %v148_v56 = vpop.f32.mrb[0].mxu0 }
 0x101   :  { %v149_v57 = vadd.f32 %v148_v56, %v77_v55  ;;  %v377_v58 = vpop.f32.mrb[1].mxu0 }
 0x103   :  { %v152_v59 = vmax.f32 %v149_v57, 0.0 }
 0x105   :  { %411 = vmatmul.mubr.f32.vlgmr.msra.gmra.mrb[0].mxu1 %v152_v59 }
 0x1d8   :  { %v223_v2 = vpop.f32.mrb[0].mxu1 }
 0x1d9   :  { %v224_v3 = vadd.f32 %v223_v2, %v156_v1  ;;  %v412_v4 = vpop.f32.mrb[1].mxu1 }
 0x1db   :  { %v227_v0 = vmax.f32 %v224_v3, 0.0 }
 0x1dd   :  { %446 = vmatmul.mubr.f32.vlgmr.msra.gmra.mrb[2].mxu0 %v227_v0 }
 0x2b0   :  { %v298_v8 = vpop.f32.mrb[2].mxu0 }
 0x2b1   :  { %v299_v9 = vadd.f32 %v298_v8, %v231_v7  ;;  %v447_v10 = vpop.f32.mrb[3].mxu0 }
 0x2b3   :  { %v307_v11 = vsel %vm306_vm2, %v299_v9, 0.0  ;;  %v305_v12 = vsel %vm304_vm3, %v299_v9, 0.0 }
 0x2b4   :  { %308 = vadd.xlane.f32.xlu0 %v307_v11 }
 0x2b8   :  { %310 = vadd.xlane.f32.xlu0 %v305_v12 }
 0x341   :  { %v309_v13 = vpop.xlane.xlu0 %308 }
 0x342   :  { %v313_v15 = vadd.f32 %v309_v13, %v305_v12 }
 0x345   :  { %v311_v14 = vpop.xlane.xlu0 %310 }
 0x346   :  { %v312_v16 = vmul.f32 0.125, %v311_v14 }
 0x348   :  { %v314_v17 = vsub.f32 %v313_v15, %v312_v16 }
 0x34a   :  { %v315_v18 = vsel %vm304_vm3, %v314_v17, 0.0 }
 0x34b   :  { %316 = vst [vmem:[#allocation7] sm:$0xff] %v315_v18 }
 0x34c   :  { %562 = shalt.err (!%p559_p6)
}
 0x34d   :  { %s563_s10 = scalar_lea.hbm %s667_s2, 128 }
 0x34e   :  { %p564_p7 = scmp.ne.s32.totalorder %s667_s2, %s563_s10  ;;  %p567_p8 = scmp.lt.u32.totalorder %s563_s10, %s667_s2 }
 0x350   :  { %p569_p9 = pnand %p567_p8, %p564_p7 }
 0x352   :  { %572 = shalt.err (!%p569_p9)
}
 0x353   :  { %326 = dma.vmem_to_hbm [thread:$0]  %s324_s6, 128, %s667_s2, [#allocation4]  }
 0x354   :  { %577 = dma.done.wait [#allocation4], 128  }
 0x355   :  { %578 = vsyncadd [#allocation4], 4294967168 }
 0x356   :  { %330 = vsyncpa [#allocation3], 1 }
 0x357   :  { %331 = vsyncpa [#allocation6], 1 }
 0x358   :  { %332 = vsyncpa [#allocation4], 1 }

</bundles_post_ra>
